<compile_context>
chip_gen: v7x
topology: tpu7x:2x2x1
jax: 0.10.0
libtpu: 0.0.40
codegen_flags: <defaults>
</compile_context>

<pallas_src>
import functools

import jax
import jax.numpy as jnp
from jax.experimental import pallas as pl
from jax.experimental.pallas import tpu as pltpu


def _round_up(x, m):
    return (x + m - 1) // m * m


def _sublane(dtype):
    # sublane packing: f32 -> 8, bf16/f16 -> 16, int8/fp8 -> 32
    return {4: 8, 2: 16, 1: 32}.get(jnp.dtype(dtype).itemsize, 8)


def _vmem_capacity_bytes():
    try:
        return int(pltpu.get_tpu_info().vmem_capacity_bytes)
    except Exception:
        # Conservative fallback valid on every TPU generation (v7x has 64 MiB).
        return 64 * 1024 * 1024


# ---------------- kernels ----------------

def _mlp_kernel(x_ref, w1_ref, b1_ref, w2_ref, b2_ref, o_ref):
    # x_ref : (tm, d0) row tile;  w1: (d0, d1), b1: (1, d1)
    # w2    : (d1, d2_pad),       b2: (1, d2_pad)
    x = x_ref[...].astype(w1_ref.dtype)              # native MXU dtype path
    h = jnp.dot(x, w1_ref[...], preferred_element_type=jnp.float32)
    h = jnp.maximum(h + b1_ref[...].astype(jnp.float32), 0.0)
    h = h.astype(w2_ref.dtype)
    out = jnp.dot(h, w2_ref[...], preferred_element_type=jnp.float32)
    out = out + b2_ref[...].astype(jnp.float32)
    o_ref[...] = out.astype(o_ref.dtype)


def _mlp_kernel_coltiled(x_ref, w1_ref, b1_ref, w2_ref, b2_ref, o_ref, h_ref):
    # grid = (row_tiles, col_tiles); the hidden activation of the current row
    # tile is computed once (col block 0) and cached in VMEM scratch.
    @pl.when(pl.program_id(1) == 0)
    def _():
        x = x_ref[...].astype(w1_ref.dtype)
        h = jnp.dot(x, w1_ref[...], preferred_element_type=jnp.float32)
        h = jnp.maximum(h + b1_ref[...].astype(jnp.float32), 0.0)
        h_ref[...] = h.astype(h_ref.dtype)

    out = jnp.dot(h_ref[...], w2_ref[...], preferred_element_type=jnp.float32)
    out = out + b2_ref[...].astype(jnp.float32)
    o_ref[...] = out.astype(o_ref.dtype)


# ---------------- wrapper ----------------

@functools.partial(
    jax.jit,
    static_argnames=("tm", "tn", "force_column_tiling", "single_buffer_params",
                     "x_buffers"))
def simple_mlp(x, w1, b1, w2, b2, *, tm=256, tn=512,
               force_column_tiling=False, single_buffer_params=True,
               x_buffers=2):
    d0, d1 = w1.shape
    _, d2 = w2.shape

    orig_shape = x.shape
    if x.ndim == 1:
        # mirrors torch: x.view(x.size(0), -1)  (only valid when d0 == 1)
        xr = x.reshape(x.shape[0], -1)
    else:
        xr = x.reshape(-1, orig_shape[-1])
    R = xr.shape[0]
    out_dtype = x.dtype

    x_isz = jnp.dtype(x.dtype).itemsize
    w1_isz = jnp.dtype(w1.dtype).itemsize
    w2_isz = jnp.dtype(w2.dtype).itemsize
    o_isz = jnp.dtype(out_dtype).itemsize

    # ---- row tiling: balanced, sublane-aligned, >=2 tiles for megacore ----
    sublane = _sublane(x.dtype)
    n_row_tiles = max(pl.cdiv(R, tm), 1)
    if n_row_tiles == 1 and R > sublane:
        n_row_tiles = 2                    # keep both v7x TensorCores busy
    tm_eff = _round_up(pl.cdiv(R, n_row_tiles), sublane)
    R_pad = _round_up(R, tm_eff)
    if R_pad != R:
        xr = jnp.pad(xr, ((0, R_pad - R), (0, 0)))
    grid_r = R_pad // tm_eff

    vmem_cap = _vmem_capacity_bytes()

    # ---- lane-dense output width + path selection ----
    d2_dense = _round_up(d2, 128)
    resident_bytes = (
        2 * tm_eff * d0 * x_isz                       # x tiles (double buffered)
        + 2 * tm_eff * d2_dense * o_isz               # out tiles
        + d0 * d1 * w1_isz + d1 * d2_dense * w2_isz   # resident weights
        + (d1 + d2_dense) * 4                         # biases
        + tm_eff * d0 * w1_isz                        # x cast copy
        + tm_eff * d1 * 4 + tm_eff * d1 * w2_isz      # f32 h + cast copy
        + tm_eff * d2_dense * 4)                      # f32 out epilogue
    use_col_tiling = bool(force_column_tiling) or (
        resident_bytes * 1.5 > 0.45 * vmem_cap)

    if not use_col_tiling:
        tn_eff = d2_dense
        d2_pad = d2_dense
    else:
        tn_eff = min(_round_up(tn, 128), _round_up(d2, 128))
        d2_pad = _round_up(d2, tn_eff)

    if d2_pad != d2:
        w2p = jnp.pad(w2, ((0, 0), (0, d2_pad - d2)))
        b2p = jnp.pad(b2, (0, d2_pad - d2))
    else:
        w2p, b2p = w2, b2

    # ---- BlockSpec helpers ----
    const_mode = pl.Buffered(1) if single_buffer_params else None

    def _const_spec(shape, index_map):
        if const_mode is not None:
            return pl.BlockSpec(shape, index_map, pipeline_mode=const_mode)
        return pl.BlockSpec(shape, index_map)

    x_mode = pl.Buffered(x_buffers) if x_buffers != 2 else None

    def _x_spec(shape, index_map):
        if x_mode is not None:
            return pl.BlockSpec(shape, index_map, pipeline_mode=x_mode)
        return pl.BlockSpec(shape, index_map)

    # ---- cost estimate (helps XLA scheduling around the custom call) ----
    flops = 2 * R_pad * (d0 * d1 + d1 * d2_pad)
    bytes_accessed = (R_pad * d0 * x_isz + d0 * d1 * w1_isz + d1 * 4
                      + d1 * d2_pad * w2_isz + d2_pad * 4
                      + R_pad * d2_pad * o_isz)
    cost = pl.CostEstimate(flops=flops, transcendentals=0,
                           bytes_accessed=bytes_accessed)

    if not use_col_tiling:
        vmem_bytes = resident_bytes
        grid = (grid_r,)
        in_specs = [
            _x_spec((tm_eff, d0), lambda i: (i, 0)),
            _const_spec((d0, d1), lambda i: (0, 0)),
            _const_spec((1, d1), lambda i: (0, 0)),
            _const_spec((d1, d2_pad), lambda i: (0, 0)),
            _const_spec((1, d2_pad), lambda i: (0, 0)),
        ]
        out_specs = pl.BlockSpec((tm_eff, d2_pad), lambda i: (i, 0))
        scratch_shapes = []
        kernel = _mlp_kernel
        dim_sem = ("parallel",)
    else:
        n_col_tiles = d2_pad // tn_eff
        vmem_bytes = (2 * tm_eff * d0 * x_isz
                      + d0 * d1 * w1_isz + d1 * 4
                      + 2 * d1 * tn_eff * w2_isz + 2 * tn_eff * 4
                      + 2 * tm_eff * tn_eff * o_isz
                      + tm_eff * d1 * w2_isz          # h scratch
                      + tm_eff * d0 * w1_isz          # x cast copy
                      + tm_eff * d1 * 4               # f32 h
                      + tm_eff * tn_eff * 4)          # f32 out epilogue
        grid = (grid_r, n_col_tiles)
        in_specs = [
            _x_spec((tm_eff, d0), lambda i, j: (i, 0)),
            _const_spec((d0, d1), lambda i, j: (0, 0)),
            _const_spec((1, d1), lambda i, j: (0, 0)),
            pl.BlockSpec((d1, tn_eff), lambda i, j: (0, j)),
            pl.BlockSpec((1, tn_eff), lambda i, j: (0, j)),
        ]
        out_specs = pl.BlockSpec((tm_eff, tn_eff), lambda i, j: (i, j))
        scratch_shapes = [pltpu.VMEM((tm_eff, d1), w2.dtype)]
        kernel = _mlp_kernel_coltiled
        dim_sem = ("parallel", "arbitrary")

    vmem_limit = int(min(max(int(vmem_bytes * 1.5), 32 * 1024 * 1024),
                         int(0.85 * vmem_cap)))

    out = pl.pallas_call(
        kernel,
        out_shape=jax.ShapeDtypeStruct((R_pad, d2_pad), out_dtype),
        grid_spec=pltpu.PrefetchScalarGridSpec(
            num_scalar_prefetch=0,
            grid=grid,
            in_specs=in_specs,
            out_specs=out_specs,
            scratch_shapes=scratch_shapes,
        ),
        compiler_params=pltpu.CompilerParams(
            dimension_semantics=dim_sem,
            vmem_limit_bytes=vmem_limit,
        ),
        cost_estimate=cost,
    )(xr, w1, b1.reshape(1, d1), w2p, b2p.reshape(1, d2_pad))

    out = out[:R, :d2]
    if x.ndim == 1:
        return out
    return out.reshape(*orig_shape[:-1], d2)


def _reference(x, w1, b1, w2, b2):
    xr = x.reshape(x.shape[0], -1) if x.ndim == 1 else x.reshape(-1, x.shape[-1])
    h = jnp.maximum(xr.astype(jnp.float32) @ w1.astype(jnp.float32)
                    + b1.astype(jnp.float32), 0.0)
    out = (h @ w2.astype(jnp.float32) + b2.astype(jnp.float32)).astype(x.dtype)
    if x.ndim == 1:
        return out
    return out.reshape(*x.shape[:-1], w2.shape[1])


# TODO(synk): gradient checkpointing (torch.utils.checkpoint) is a training-time
# memory optimization; it has no effect on forward semantics and is not translated.

if __name__ == "__main__":
    key = jax.random.PRNGKey(0)
    batch, seq = 2, 8              # rows = batch * seq = 16
    d0, d1, d2 = 32, 64, 32        # dims = [32, 64, 32]

    kx, kw1, kb1, kw2, kb2 = jax.random.split(key, 5)
    x = jax.random.normal(kx, (batch * seq, d0), dtype=jnp.float32)
    w1 = jax.random.normal(kw1, (d0, d1), dtype=jnp.float32) / jnp.sqrt(d0)
    b1 = 0.05 * jax.random.normal(kb1, (d1,), dtype=jnp.float32)
    w2 = jax.random.normal(kw2, (d1, d2), dtype=jnp.float32) / jnp.sqrt(d1)
    b2 = 0.05 * jax.random.normal(kb2, (d2,), dtype=jnp.float32)

    def _run(*args, **kw):
        try:
            return simple_mlp(*args, **kw)
        except Exception:
            # Fallback if this jax build rejects single-buffered pipeline_mode.
            return simple_mlp(*args, single_buffer_params=False, **kw)

    # Path A: fully-resident weights, lane-dense (padded-to-128) output.
    out = jax.block_until_ready(_run(x, w1, b1, w2, b2))
    ref = _reference(x, w1, b1, w2, b2)
    assert out.shape == (batch * seq, d2)
    assert jnp.max(jnp.abs(out - ref)) < 1e-3

    # Path B: column-tiled over d2 (exercised at a small size with tn=128).
    kw2b, kb2b = jax.random.split(kw2, 2)
    d2b = 256
    w2b = jax.random.normal(kw2b, (d1, d2b), dtype=jnp.float32) / jnp.sqrt(d1)
    b2b = 0.05 * jax.random.normal(kb2b, (d2b,), dtype=jnp.float32)
    out_b = jax.block_until_ready(
        _run(x, w1, b1, w2b, b2b, tn=128, force_column_tiling=True))
    ref_b = _reference(x, w1, b1, w2b, b2b)
    assert out_b.shape == (batch * seq, d2b)
    assert jnp.max(jnp.abs(out_b - ref_b)) < 1e-3

    print("KERNEL_OK")
</pallas_src>

<mosaic_0001>
module attributes {stable_mosaic.version = 11 : i64} {
  func.func @_mlp_kernel(%arg0: i32, %arg1: memref<8x32xf32, #tpu.memory_space<vmem>>, %arg2: memref<32x64xf32, #tpu.memory_space<vmem>>, %arg3: memref<1x64xf32, #tpu.memory_space<vmem>>, %arg4: memref<64x128xf32, #tpu.memory_space<vmem>>, %arg5: memref<1x128xf32, #tpu.memory_space<vmem>>, %arg6: memref<8x128xf32, #tpu.memory_space<vmem>>) attributes {dimension_semantics = [#tpu.dimension_semantics<parallel>], iteration_bounds = array<i64: 2>, scalar_prefetch = 0 : i64, scratch_operands = 0 : i64, tpu.core_type = #tpu.core_type<tc>, window_params = [{transform_indices = @transform_0, window_bounds = array<i64: 8, 32>}, {pipeline_mode = #tpu.pipeline_mode<synchronous>, transform_indices = @transform_1, window_bounds = array<i64: 32, 64>}, {pipeline_mode = #tpu.pipeline_mode<synchronous>, transform_indices = @transform_2, window_bounds = array<i64: 1, 64>}, {pipeline_mode = #tpu.pipeline_mode<synchronous>, transform_indices = @transform_3, window_bounds = array<i64: 64, 128>}, {pipeline_mode = #tpu.pipeline_mode<synchronous>, transform_indices = @transform_4, window_bounds = array<i64: 1, 128>}, {transform_indices = @transform_5, window_bounds = array<i64: 8, 128>}]} {
    %c0 = arith.constant 0 : index
    %c0_0 = arith.constant 0 : index
    %0 = vector.load %arg1[%c0, %c0_0] : memref<8x32xf32, #tpu.memory_space<vmem>>, vector<8x32xf32>
    %c0_1 = arith.constant 0 : index
    %c0_2 = arith.constant 0 : index
    %1 = vector.load %arg2[%c0_1, %c0_2] : memref<32x64xf32, #tpu.memory_space<vmem>>, vector<32x64xf32>
    %cst = arith.constant dense<0.000000e+00> : vector<8x64xf32>
    %2 = tpu.matmul %0, %1, %cst {dimension_numbers = #tpu.dot_dimension_numbers<[1], [0], [0], [1], [0, 0, 1, 1], [], []>} : vector<8x32xf32>, vector<32x64xf32>, vector<8x64xf32> -> vector<8x64xf32>
    %c0_3 = arith.constant 0 : index
    %c0_4 = arith.constant 0 : index
    %3 = vector.load %arg3[%c0_3, %c0_4] : memref<1x64xf32, #tpu.memory_space<vmem>>, vector<1x64xf32>
    %4 = vector.broadcast %3 : vector<1x64xf32> to vector<8x64xf32>
    %5 = arith.addf %2, %4 : vector<8x64xf32>
    %cst_5 = arith.constant 0.000000e+00 : f32
    %6 = vector.broadcast %cst_5 : f32 to vector<8x64xf32>
    %7 = arith.maximumf %5, %6 : vector<8x64xf32>
    %c0_6 = arith.constant 0 : index
    %c0_7 = arith.constant 0 : index
    %8 = vector.load %arg4[%c0_6, %c0_7] : memref<64x128xf32, #tpu.memory_space<vmem>>, vector<64x128xf32>
    %cst_8 = arith.constant dense<0.000000e+00> : vector<8x128xf32>
    %9 = tpu.matmul %7, %8, %cst_8 {dimension_numbers = #tpu.dot_dimension_numbers<[1], [0], [0], [1], [0, 0, 1, 1], [], []>} : vector<8x64xf32>, vector<64x128xf32>, vector<8x128xf32> -> vector<8x128xf32>
    %c0_9 = arith.constant 0 : index
    %c0_10 = arith.constant 0 : index
    %10 = vector.load %arg5[%c0_9, %c0_10] : memref<1x128xf32, #tpu.memory_space<vmem>>, vector<1x128xf32>
    %11 = vector.broadcast %10 : vector<1x128xf32> to vector<8x128xf32>
    %12 = arith.addf %9, %11 : vector<8x128xf32>
    %c0_11 = arith.constant 0 : index
    %c0_12 = arith.constant 0 : index
    %13 = vector.load %arg6[%c0_11, %c0_12] : memref<8x128xf32, #tpu.memory_space<vmem>>, vector<8x128xf32>
    tpu.vector_store %arg6[%c0_11, %c0_12], %12 {strides = array<i32>} : memref<8x128xf32, #tpu.memory_space<vmem>>, vector<8x128xf32>,
    return
  }
  func.func @transform_0(%arg0: i32) -> (i32, i32) {
    %c0_i32 = arith.constant 0 : i32
    %c0_i32_0 = arith.constant 0 : i32
    return %arg0, %c0_i32 : i32, i32
  }
  func.func @transform_1(%arg0: i32) -> (i32, i32) {
    %c0_i32 = arith.constant 0 : i32
    %c0_i32_0 = arith.constant 0 : i32
    %c0_i32_1 = arith.constant 0 : i32
    return %c0_i32, %c0_i32_0 : i32, i32
  }
  func.func @transform_2(%arg0: i32) -> (i32, i32) {
    %c0_i32 = arith.constant 0 : i32
    %c0_i32_0 = arith.constant 0 : i32
    %c0_i32_1 = arith.constant 0 : i32
    return %c0_i32, %c0_i32_0 : i32, i32
  }
  func.func @transform_3(%arg0: i32) -> (i32, i32) {
    %c0_i32 = arith.constant 0 : i32
    %c0_i32_0 = arith.constant 0 : i32
    %c0_i32_1 = arith.constant 0 : i32
    return %c0_i32, %c0_i32_0 : i32, i32
  }
  func.func @transform_4(%arg0: i32) -> (i32, i32) {
    %c0_i32 = arith.constant 0 : i32
    %c0_i32_0 = arith.constant 0 : i32
    %c0_i32_1 = arith.constant 0 : i32
    return %c0_i32, %c0_i32_0 : i32, i32
  }
  func.func @transform_5(%arg0: i32) -> (i32, i32) {
    %c0_i32 = arith.constant 0 : i32
    %c0_i32_0 = arith.constant 0 : i32
    return %arg0, %c0_i32 : i32, i32
  }
}

module attributes {stable_mosaic.version = 11 : i64} {
  func.func @_mlp_kernel(%arg0: i32, %arg1: memref<8x32xf32, #tpu.memory_space<vmem>>, %arg2: memref<32x64xf32, #tpu.memory_space<vmem>>, %arg3: memref<1x64xf32, #tpu.memory_space<vmem>>, %arg4: memref<64x128xf32, #tpu.memory_space<vmem>>, %arg5: memref<1x128xf32, #tpu.memory_space<vmem>>, %arg6: memref<8x128xf32, #tpu.memory_space<vmem>>) attributes {dimension_semantics = [#tpu.dimension_semantics<parallel>], iteration_bounds = array<i64: 2>, scalar_prefetch = 0 : i64, scratch_operands = 0 : i64, tpu.core_type = #tpu.core_type<tc>, window_params = [{transform_indices = @transform_0, window_bounds = array<i64: 8, 32>}, {pipeline_mode = #tpu.pipeline_mode<synchronous>, transform_indices = @transform_1, window_bounds = array<i64: 32, 64>}, {pipeline_mode = #tpu.pipeline_mode<synchronous>, transform_indices = @transform_2, window_bounds = array<i64: 1, 64>}, {pipeline_mode = #tpu.pipeline_mode<synchronous>, transform_indices = @transform_3, window_bounds = array<i64: 64, 128>}, {pipeline_mode = #tpu.pipeline_mode<synchronous>, transform_indices = @transform_4, window_bounds = array<i64: 1, 128>}, {transform_indices = @transform_5, window_bounds = array<i64: 8, 128>}]} {
    %c0 = arith.constant 0 : index
    %c0_0 = arith.constant 0 : index
    %0 = vector.load %arg1[%c0, %c0_0] : memref<8x32xf32, #tpu.memory_space<vmem>>, vector<8x32xf32>
    %c0_1 = arith.constant 0 : index
    %c0_2 = arith.constant 0 : index
    %1 = vector.load %arg2[%c0_1, %c0_2] : memref<32x64xf32, #tpu.memory_space<vmem>>, vector<32x64xf32>
    %cst = arith.constant dense<0.000000e+00> : vector<8x64xf32>
    %2 = tpu.matmul %0, %1, %cst {dimension_numbers = #tpu.dot_dimension_numbers<[1], [0], [0], [1], [0, 0, 1, 1], [], []>} : vector<8x32xf32>, vector<32x64xf32>, vector<8x64xf32> -> vector<8x64xf32>
    %c0_3 = arith.constant 0 : index
    %c0_4 = arith.constant 0 : index
    %3 = vector.load %arg3[%c0_3, %c0_4] : memref<1x64xf32, #tpu.memory_space<vmem>>, vector<1x64xf32>
    %4 = vector.broadcast %3 : vector<1x64xf32> to vector<8x64xf32>
    %5 = arith.addf %2, %4 : vector<8x64xf32>
    %cst_5 = arith.constant 0.000000e+00 : f32
    %6 = vector.broadcast %cst_5 : f32 to vector<8x64xf32>
    %7 = arith.maximumf %5, %6 : vector<8x64xf32>
    %c0_6 = arith.constant 0 : index
    %c0_7 = arith.constant 0 : index
    %8 = vector.load %arg4[%c0_6, %c0_7] : memref<64x128xf32, #tpu.memory_space<vmem>>, vector<64x128xf32>
    %cst_8 = arith.constant dense<0.000000e+00> : vector<8x128xf32>
    %9 = tpu.matmul %7, %8, %cst_8 {dimension_numbers = #tpu.dot_dimension_numbers<[1], [0], [0], [1], [0, 0, 1, 1], [], []>} : vector<8x64xf32>, vector<64x128xf32>, vector<8x128xf32> -> vector<8x128xf32>
    %c0_9 = arith.constant 0 : index
    %c0_10 = arith.constant 0 : index
    %10 = vector.load %arg5[%c0_9, %c0_10] : memref<1x128xf32, #tpu.memory_space<vmem>>, vector<1x128xf32>
    %11 = vector.broadcast %10 : vector<1x128xf32> to vector<8x128xf32>
    %12 = arith.addf %9, %11 : vector<8x128xf32>
    %c0_11 = arith.constant 0 : index
    %c0_12 = arith.constant 0 : index
    %13 = vector.load %arg6[%c0_11, %c0_12] : memref<8x128xf32, #tpu.memory_space<vmem>>, vector<8x128xf32>
    tpu.vector_store %arg6[%c0_11, %c0_12], %12 {strides = array<i32>} : memref<8x128xf32, #tpu.memory_space<vmem>>, vector<8x128xf32>,
    return
  }
  func.func @transform_0(%arg0: i32) -> (i32, i32) {
    %c0_i32 = arith.constant 0 : i32
    %c0_i32_0 = arith.constant 0 : i32
    return %arg0, %c0_i32 : i32, i32
  }
  func.func @transform_1(%arg0: i32) -> (i32, i32) {
    %c0_i32 = arith.constant 0 : i32
    %c0_i32_0 = arith.constant 0 : i32
    %c0_i32_1 = arith.constant 0 : i32
    return %c0_i32, %c0_i32_0 : i32, i32
  }
  func.func @transform_2(%arg0: i32) -> (i32, i32) {
    %c0_i32 = arith.constant 0 : i32
    %c0_i32_0 = arith.constant 0 : i32
    %c0_i32_1 = arith.constant 0 : i32
    return %c0_i32, %c0_i32_0 : i32, i32
  }
  func.func @transform_3(%arg0: i32) -> (i32, i32) {
    %c0_i32 = arith.constant 0 : i32
    %c0_i32_0 = arith.constant 0 : i32
    %c0_i32_1 = arith.constant 0 : i32
    return %c0_i32, %c0_i32_0 : i32, i32
  }
  func.func @transform_4(%arg0: i32) -> (i32, i32) {
    %c0_i32 = arith.constant 0 : i32
    %c0_i32_0 = arith.constant 0 : i32
    %c0_i32_1 = arith.constant 0 : i32
    return %c0_i32, %c0_i32_0 : i32, i32
  }
  func.func @transform_5(%arg0: i32) -> (i32, i32) {
    %c0_i32 = arith.constant 0 : i32
    %c0_i32_0 = arith.constant 0 : i32
    return %arg0, %c0_i32 : i32, i32
  }
}

</mosaic_0001>

<bundles_post_ra>
// kernel: simple_mlp.1
= control target key start
LH: loop header
LB: loop body
LE: loop exit
PB: predicated region body
PF: predicated region fallthrough
CT: control target
= control target key end

     0   :  { %10 = vsyncpa [#allocation3], 0  ;;  %s828_s0 = inlined_call_operand.vmem [shape: f32[16,32], index: 0, kind: input, shape index: {}]   ;;  %s829_s1 = inlined_call_operand.vmem [shape: f32[32,64], index: 1, kind: input, shape index: {}]   ;;  %s830_s2 = inlined_call_operand.vmem [shape: f32[1,64], index: 2, kind: input, shape index: {}]   ;;  %s831_s3 = inlined_call_operand.vmem [shape: f32[64,128], index: 3, kind: input, shape index: {}]   ;;  %s832_s4 = inlined_call_operand.vmem [shape: f32[1,128], index: 4, kind: input, shape index: {}]   ;;  %s833_s5 = inlined_call_operand.hbm [shape: f32[16,128], index: 5, kind: output, shape index: {}]  }
   0x1   :  { %12 = vsyncpa [#allocation3 + $0x1], 0  ;;  %s686_s18 = smov 0   ;;  %s688_s19 = smov 0  }
   0x2   :  { %s690_s20 = smov 0   ;;  %s692_s21 = smov 0  }
   0x3 LB: > { %s707_s22 = sadd.s32 4294967295, %s650_s21   ;;  %s470_s23 = sadd.s32 4294967294, %s650_s21   ;;  %s650_s21 = sphi %s692_s21, %s839_s21   ;;  %s646_s20 = sphi %s690_s20, %s838_s20   ;;  %s642_s19 = sphi %s688_s19, %s837_s19   ;;  %s638_s18 = sphi %s686_s18, %s836_s18  }
   0x4   : > { %s711_s24 = sadd.s32 1, %s650_s21   ;;  %s135_s25 = sadd.s32 1, %s646_s20 }
   0x5   : > { %s132_s26 = ssub.s32 %s650_s21, %s711_s24  ;;  %p145_p0 = scmp.ne.s32.totalorder %s646_s20, %s642_s19 }
   0x6   : > { %p133_p1 = scmp.eq.s32.totalorder %s132_s26, 0  ;;  %p146_p2 = scmp.eq.s32.totalorder %s707_s22, 1 }
   0x7   : > { %p151_p3 = scmp.ne.s32.totalorder %s642_s19, %s638_s18  ;;  %p152_p4 = scmp.eq.s32.totalorder %s470_s23, 1 }
   0x8   : > { %s722_s27 = scalar_select %p133_p1, %s646_s20, %s135_s25  }
   0x9   : > { %p724_p5 = por %p146_p2, %p145_p0  ;;  %p728_p6 = por %p152_p4, %p151_p3 }
   0xa   : > { %p473_p7 = scmp.ge.s32.totalorder %s650_s21, 1  ;;  %p189_p8 = scmp.lt.s32.totalorder %s650_s21, 3 }
   0xc   : > { %p190_p9 = pnand %p473_p7, %p189_p8 }
   0xd   : > { %v221_v0 = vld [vmem:[%s829_s1] sm:$0xff] (!%p190_p9)  ;;  %v222_v1 = vld [vmem:[%s829_s1 + $0x8] sm:$0xff] (!%p190_p9)  ;;  %v223_v2 = vld [vmem:[%s829_s1 + $0x10] sm:$0xff] (!%p190_p9)  ;;  %v652_v3 = vmov (!%p190_p9), 0.0|0.0   ;;  %vm653_vm0 = vmmov (!%p190_p9), 0   ;;  %v654_v6 = vmov (!%p190_p9), 0.0  }
   0xe   : > { %193 = sbr.rel (%p190_p9) target bundleno = 470 (0x1d6), region = 40  ;;  %528 = vmatprep.subr.bf16.mxu0 (!%p190_p9), %v652_v3  ;;  %v529_v4 = vpack.c.bf16 (!%p190_p9), %v222_v1, %v221_v0  ;;  %v224_v5 = vld [vmem:[%s829_s1 + $0x18] sm:$0xff] (!%p190_p9)  ;;  %506 = vmatprep.mubr.msk.f32.mxu0 (!%p190_p9), %vm653_vm0, %v654_v6  ;;  %p216_p10 = scmp.lt.s32.totalorder (!%p190_p9), %s707_s22, 1  ;;  %v307_v7 = vld [vmem:[%s831_s3] sm:$0xff] (!%p190_p9)  ;;  %v308_v8 = vld [vmem:[%s831_s3 + $0x8] sm:$0xff] (!%p190_p9)  ;;  %vm232_vm1 = vcmask (!%p190_p9), 261120  }
   0xf   : > { %534 = vmatprep.subr.bf16.mxu1 (!%p190_p9), %v652_v3  ;;  %v535_v9 = vpack.c.bf16 (!%p190_p9), %v308_v8, %v307_v7  ;;  %v309_v10 = vld [vmem:[%s831_s3 + $0x10] sm:$0xff] (!%p190_p9)  ;;  %v310_v11 = vld [vmem:[%s831_s3 + $0x18] sm:$0xff] (!%p190_p9)  ;;  %525 = vmatprep.mubr.msk.f32.mxu1 (!%p190_p9), %vm653_vm0, %v654_v6  ;;  %v532_v12 = vpack.c.bf16 (!%p190_p9), %v224_v5, %v223_v2  ;;  %v311_v14 = vld [vmem:[%s831_s3 + $0x20] sm:$0xff] (!%p190_p9)  ;;  %vm322_vm2 = vcmask (!%p190_p9), 523264   ;;  %s213_s26 = sand.u32 (!%p190_p9), 1, %s642_s19   ;;  %s481_s8 = sshll.u32 (!%p190_p9), %s707_s22, 7 }
  0x10   : > { %530 = vmatpush3.bf16.msra.mxu0 (!%p190_p9), %v529_v4  ;;  %v538_v13 = vpack.c.bf16 (!%p190_p9), %v310_v11, %v309_v10  ;;  %v312_v15 = vld [vmem:[%s831_s3 + $0x28] sm:$0xff] (!%p190_p9)  ;;  %v313_v18 = vld [vmem:[%s831_s3 + $0x30] sm:$0xff] (!%p190_p9)  ;;  %v314_v19 = vld [vmem:[%s831_s3 + $0x38] sm:$0xff] (!%p190_p9)  ;;  %s398_s14 = scalar_lea.sflag (!%p190_p9), [#allocation3], %s213_s26 }
  0x11   : > { %531 = vmatprep.subr.bf16.mxu0 (!%p190_p9), %v652_v3  ;;  %536 = vmatpush3.bf16.msra.mxu1 (!%p190_p9), %v535_v9  ;;  %v541_v17 = vpack.c.bf16 (!%p190_p9), %v312_v15, %v311_v14  ;;  %v544_v20 = vpack.c.bf16 (!%p190_p9), %v314_v19, %v313_v18  ;;  %v476_v21 = vld [vmem:[%s830_s2] ss:$0 sm:$0xff] (!%p190_p9) }
  0x12   : > { %537 = vmatprep.subr.bf16.mxu1 (!%p190_p9), %v652_v3  ;;  %v478_v26 = vld [vmem:[%s832_s4] ss:$0 sm:$0xff] (!%p190_p9) }
  0x14   : > { %533 = vmatpush3.bf16.msra.mxu0 (!%p190_p9), %v532_v12 }
  0x15   : > { %s217_s30 = scalar_select %p216_p10, %s707_s22, 1  ;;  %539 = vmatpush3.bf16.msra.mxu1 %v538_v13 }
  0x16   : > { %540 = vmatprep.subr.bf16.mxu1 %v652_v3  ;;  %s655_s22 = smov [#allocation2]  }
  0x17   : > { %s475_s6 = sshll.u32 %s217_s30, 3  ;;  %s474_s30 = sshll.u32 %s213_s26, 3 }
  0x18   : > { %s219_s13 = scalar_lea.vmem %s828_s0, %s475_s6  ;;  %s215_s9 = scalar_lea.vmem [#allocation2], %s474_s30 }
  0x19   : > { %v220_v16 = vld [vmem:[%s219_s13] sm:$0xff]  ;;  %542 = vmatpush3.bf16.msra.mxu1 %v541_v17  ;;  %s411_s10 = sshll.u32 %s215_s9, 4  ;;  %s786_s13 = scalar_lea.hbm %s833_s5, %s481_s8  ;;  %s788_s10 = int_to_ptr.vmem [resolvable:$true] %s411_s10 }
  0x1a   : > { %507 = vmatmul.mubr.msk.f32.vlgmr.msra.gmra.mrb[0].mxu0 %vm232_vm1, %v220_v16  ;;  %543 = vmatprep.subr.bf16.mxu1 %v652_v3  ;;  %s588_s15 = scalar_lea.vmem %s788_s10, 128  ;;  %s592_s16 = sshll.u32 %s655_s22, 4  ;;  %s593_s16 = int_to_ptr.vmem [resolvable:$false] %s592_s16 }
  0x1b   : > { %p589_p11 = scmp.ne.s32.totalorder %s788_s10, %s588_s15  ;;  %s594_s17 = scalar_lea.vmem %s593_s16, 256 }
  0x1c   : > { %p595_p0 = scmp.lt.s32.totalorder %s788_s10, %s593_s16  ;;  %p596_p1 = scmp.lt.s32.totalorder %s594_s17, %s588_s15 }
  0x1d   : > { %545 = vmatpush3.bf16.msra.mxu1 %v544_v20  ;;  %p590_p12 = pnand %p589_p11, %p724_p5 }
  0x1e   : > { %p597_p2 = por %p596_p1, %p595_p0 }
  0x1f   : > { %p591_p13 = pneg %p590_p12 }
  0x21   : > { %p598_p3 = pnand %p597_p2, %p591_p13 }
  0xed   : > { %v302_v22 = vpop.f32.mrb[0].mxu0 }
  0xee   : > { %v303_v23 = vadd.f32 %v476_v21, %v302_v22  ;;  %v508_v24 = vpop.f32.mrb[1].mxu0 }
  0xf0   : > { %v306_v25 = vmax.f32 %v303_v23, 0.0 }
  0xf2   : > { %526 = vmatmul.mubr.msk.f32.vlgmr.msra.gmra.mrb[0].mxu1 %vm322_vm2, %v306_v25 }
 0x1c5   : > { %v392_v27 = vpop.f32.mrb[0].mxu1 }
 0x1c6   : > { %v393_v28 = vadd.f32 %v478_v26, %v392_v27  ;;  %v527_v29 = vpop.f32.mrb[1].mxu1 }
 0x1c8   : > { %396 = vst [vmem:[%s215_s9] sm:$0xff] %v393_v28 }
 0x1c9   : > { %601 = shalt.err (!%p598_p3)
}
 0x1ca   : > { %s602_s23 = scalar_lea.hbm %s786_s13, 128  ;;  %s606_s30 = scalar_lea.hbm %s833_s5, 256 }
 0x1cb   : > { %p603_p4 = scmp.ne.s32.totalorder %s786_s13, %s602_s23  ;;  %p607_p9 = scmp.lt.u32.totalorder %s786_s13, %s833_s5 }
 0x1cc   : > { %p608_p10 = scmp.lt.u32.totalorder %s606_s30, %s602_s23  ;;  %p610_p12 = scmp.lt.u32.totalorder %s602_s23, %s786_s13 }
 0x1cd   : > { %p604_p7 = pnand %p603_p4, %p724_p5 }
 0x1ce   : > { %p609_p11 = por %p608_p10, %p607_p9 }
 0x1cf   : > { %p605_p8 = pneg %p604_p7 }
 0x1d0   : > { %p611_p13 = por %p610_p12, %p609_p11 }
 0x1d2   : > { %p612_p0 = pnand %p611_p13, %p605_p8 }
 0x1d4   : > { %615 = shalt.err (!%p612_p0)
}
 0x1d5   : > { %546 = dma.vmem_to_hbm [thread:$0]  (%p724_p5), %s788_s10, 128, %s786_s13, %s398_s14  }
 0x1d6 PF: > { %p552_p1 = scmp.ge.s32.totalorder %s650_s21, 2  ;;  %s423_s8 = sand.u32 1, %s638_s18  }
 0x1d7   : > { %s424_s9 = scalar_lea.sflag [#allocation3], %s423_s8 }
 0x1d8   : > { %p549_p2 = pnand %p552_p1, %p728_p6 }
 0x1da   : > { %633 = dma.done.wait (!%p549_p2), %s424_s9, 128  }
 0x1db   : > { %635 = vsyncadd (!%p549_p2), %s424_s9, 4294967168  ;;  %p15_p3 = scmp.ge.s32.totalorder %s711_s24, 4   ;;  %s836_s18 = smov %s642_s19 }
 0x1dc   : > { %s837_s19 = smov %s646_s20  ;;  %s838_s20 = smov %s722_s27 }
 0x1dd   : > { %s839_s21 = smov %s711_s24  ;;  %17 = sbr.rel (!%p15_p3) target bundleno = 3 (0x3), region = 75 }
 0x1e4   :  { %429 = vsyncpa [#allocation3], 1 }
 0x1e5   :  { %431 = vsyncpa [#allocation3 + $0x1], 1 }

// kernel: simple_mlp.1
= control target key start
LH: loop header
LB: loop body
LE: loop exit
PB: predicated region body
PF: predicated region fallthrough
CT: control target
= control target key end

     0   :  { %10 = vsyncpa [#allocation3], 0  ;;  %s828_s0 = inlined_call_operand.vmem [shape: f32[16,32], index: 0, kind: input, shape index: {}]   ;;  %s829_s1 = inlined_call_operand.vmem [shape: f32[32,64], index: 1, kind: input, shape index: {}]   ;;  %s830_s2 = inlined_call_operand.vmem [shape: f32[1,64], index: 2, kind: input, shape index: {}]   ;;  %s831_s3 = inlined_call_operand.vmem [shape: f32[64,128], index: 3, kind: input, shape index: {}]   ;;  %s832_s4 = inlined_call_operand.vmem [shape: f32[1,128], index: 4, kind: input, shape index: {}]   ;;  %s833_s5 = inlined_call_operand.hbm [shape: f32[16,128], index: 5, kind: output, shape index: {}]  }
   0x1   :  { %12 = vsyncpa [#allocation3 + $0x1], 0  ;;  %s686_s18 = smov 0   ;;  %s688_s19 = smov 0  }
   0x2   :  { %s690_s20 = smov 0   ;;  %s692_s21 = smov 0  }
   0x3 LB: > { %s707_s22 = sadd.s32 4294967295, %s650_s21   ;;  %s470_s23 = sadd.s32 4294967294, %s650_s21   ;;  %s650_s21 = sphi %s692_s21, %s839_s21   ;;  %s646_s20 = sphi %s690_s20, %s838_s20   ;;  %s642_s19 = sphi %s688_s19, %s837_s19   ;;  %s638_s18 = sphi %s686_s18, %s836_s18  }
   0x4   : > { %s711_s24 = sadd.s32 1, %s650_s21   ;;  %s135_s25 = sadd.s32 1, %s646_s20 }
   0x5   : > { %s132_s26 = ssub.s32 %s650_s21, %s711_s24  ;;  %p145_p0 = scmp.ne.s32.totalorder %s646_s20, %s642_s19 }
   0x6   : > { %p133_p1 = scmp.eq.s32.totalorder %s132_s26, 0  ;;  %p146_p2 = scmp.eq.s32.totalorder %s707_s22, 1 }
   0x7   : > { %p151_p3 = scmp.ne.s32.totalorder %s642_s19, %s638_s18  ;;  %p152_p4 = scmp.eq.s32.totalorder %s470_s23, 1 }
   0x8   : > { %s722_s27 = scalar_select %p133_p1, %s646_s20, %s135_s25  }
   0x9   : > { %p724_p5 = por %p146_p2, %p145_p0  ;;  %p728_p6 = por %p152_p4, %p151_p3 }
   0xa   : > { %p473_p7 = scmp.ge.s32.totalorder %s650_s21, 1  ;;  %p189_p8 = scmp.lt.s32.totalorder %s650_s21, 3 }
   0xc   : > { %p190_p9 = pnand %p473_p7, %p189_p8 }
   0xd   : > { %v221_v0 = vld [vmem:[%s829_s1] sm:$0xff] (!%p190_p9)  ;;  %v222_v1 = vld [vmem:[%s829_s1 + $0x8] sm:$0xff] (!%p190_p9)  ;;  %v223_v2 = vld [vmem:[%s829_s1 + $0x10] sm:$0xff] (!%p190_p9)  ;;  %v652_v3 = vmov (!%p190_p9), 0.0|0.0   ;;  %vm653_vm0 = vmmov (!%p190_p9), 0   ;;  %v654_v6 = vmov (!%p190_p9), 0.0  }
   0xe   : > { %193 = sbr.rel (%p190_p9) target bundleno = 470 (0x1d6), region = 40  ;;  %528 = vmatprep.subr.bf16.mxu0 (!%p190_p9), %v652_v3  ;;  %v529_v4 = vpack.c.bf16 (!%p190_p9), %v222_v1, %v221_v0  ;;  %v224_v5 = vld [vmem:[%s829_s1 + $0x18] sm:$0xff] (!%p190_p9)  ;;  %506 = vmatprep.mubr.msk.f32.mxu0 (!%p190_p9), %vm653_vm0, %v654_v6  ;;  %p216_p10 = scmp.lt.s32.totalorder (!%p190_p9), %s707_s22, 1  ;;  %v307_v7 = vld [vmem:[%s831_s3] sm:$0xff] (!%p190_p9)  ;;  %v308_v8 = vld [vmem:[%s831_s3 + $0x8] sm:$0xff] (!%p190_p9)  ;;  %vm232_vm1 = vcmask (!%p190_p9), 261120  }
   0xf   : > { %534 = vmatprep.subr.bf16.mxu1 (!%p190_p9), %v652_v3  ;;  %v535_v9 = vpack.c.bf16 (!%p190_p9), %v308_v8, %v307_v7  ;;  %v309_v10 = vld [vmem:[%s831_s3 + $0x10] sm:$0xff] (!%p190_p9)  ;;  %v310_v11 = vld [vmem:[%s831_s3 + $0x18] sm:$0xff] (!%p190_p9)  ;;  %525 = vmatprep.mubr.msk.f32.mxu1 (!%p190_p9), %vm653_vm0, %v654_v6  ;;  %v532_v12 = vpack.c.bf16 (!%p190_p9), %v224_v5, %v223_v2  ;;  %v311_v14 = vld [vmem:[%s831_s3 + $0x20] sm:$0xff] (!%p190_p9)  ;;  %vm322_vm2 = vcmask (!%p190_p9), 523264   ;;  %s213_s26 = sand.u32 (!%p190_p9), 1, %s642_s19   ;;  %s481_s8 = sshll.u32 (!%p190_p9), %s707_s22, 7 }
  0x10   : > { %530 = vmatpush3.bf16.msra.mxu0 (!%p190_p9), %v529_v4  ;;  %v538_v13 = vpack.c.bf16 (!%p190_p9), %v310_v11, %v309_v10  ;;  %v312_v15 = vld [vmem:[%s831_s3 + $0x28] sm:$0xff] (!%p190_p9)  ;;  %v313_v18 = vld [vmem:[%s831_s3 + $0x30] sm:$0xff] (!%p190_p9)  ;;  %v314_v19 = vld [vmem:[%s831_s3 + $0x38] sm:$0xff] (!%p190_p9)  ;;  %s398_s14 = scalar_lea.sflag (!%p190_p9), [#allocation3], %s213_s26 }
  0x11   : > { %531 = vmatprep.subr.bf16.mxu0 (!%p190_p9), %v652_v3  ;;  %536 = vmatpush3.bf16.msra.mxu1 (!%p190_p9), %v535_v9  ;;  %v541_v17 = vpack.c.bf16 (!%p190_p9), %v312_v15, %v311_v14  ;;  %v544_v20 = vpack.c.bf16 (!%p190_p9), %v314_v19, %v313_v18  ;;  %v476_v21 = vld [vmem:[%s830_s2] ss:$0 sm:$0xff] (!%p190_p9) }
  0x12   : > { %537 = vmatprep.subr.bf16.mxu1 (!%p190_p9), %v652_v3  ;;  %v478_v26 = vld [vmem:[%s832_s4] ss:$0 sm:$0xff] (!%p190_p9) }
  0x14   : > { %533 = vmatpush3.bf16.msra.mxu0 (!%p190_p9), %v532_v12 }
  0x15   : > { %s217_s30 = scalar_select %p216_p10, %s707_s22, 1  ;;  %539 = vmatpush3.bf16.msra.mxu1 %v538_v13 }
  0x16   : > { %540 = vmatprep.subr.bf16.mxu1 %v652_v3  ;;  %s655_s22 = smov [#allocation2]  }
  0x17   : > { %s475_s6 = sshll.u32 %s217_s30, 3  ;;  %s474_s30 = sshll.u32 %s213_s26, 3 }
  0x18   : > { %s219_s13 = scalar_lea.vmem %s828_s0, %s475_s6  ;;  %s215_s9 = scalar_lea.vmem [#allocation2], %s474_s30 }
  0x19   : > { %v220_v16 = vld [vmem:[%s219_s13] sm:$0xff]  ;;  %542 = vmatpush3.bf16.msra.mxu1 %v541_v17  ;;  %s411_s10 = sshll.u32 %s215_s9, 4  ;;  %s786_s13 = scalar_lea.hbm %s833_s5, %s481_s8  ;;  %s788_s10 = int_to_ptr.vmem [resolvable:$true] %s411_s10 }
  0x1a   : > { %507 = vmatmul.mubr.msk.f32.vlgmr.msra.gmra.mrb[0].mxu0 %vm232_vm1, %v220_v16  ;;  %543 = vmatprep.subr.bf16.mxu1 %v652_v3  ;;  %s588_s15 = scalar_lea.vmem %s788_s10, 128  ;;  %s592_s16 = sshll.u32 %s655_s22, 4  ;;  %s593_s16 = int_to_ptr.vmem [resolvable:$false] %s592_s16 }
  0x1b   : > { %p589_p11 = scmp.ne.s32.totalorder %s788_s10, %s588_s15  ;;  %s594_s17 = scalar_lea.vmem %s593_s16, 256 }
  0x1c   : > { %p595_p0 = scmp.lt.s32.totalorder %s788_s10, %s593_s16  ;;  %p596_p1 = scmp.lt.s32.totalorder %s594_s17, %s588_s15 }
  0x1d   : > { %545 = vmatpush3.bf16.msra.mxu1 %v544_v20  ;;  %p590_p12 = pnand %p589_p11, %p724_p5 }
  0x1e   : > { %p597_p2 = por %p596_p1, %p595_p0 }
  0x1f   : > { %p591_p13 = pneg %p590_p12 }
  0x21   : > { %p598_p3 = pnand %p597_p2, %p591_p13 }
  0xed   : > { %v302_v22 = vpop.f32.mrb[0].mxu0 }
  0xee   : > { %v303_v23 = vadd.f32 %v476_v21, %v302_v22  ;;  %v508_v24 = vpop.f32.mrb[1].mxu0 }
  0xf0   : > { %v306_v25 = vmax.f32 %v303_v23, 0.0 }
  0xf2   : > { %526 = vmatmul.mubr.msk.f32.vlgmr.msra.gmra.mrb[0].mxu1 %vm322_vm2, %v306_v25 }
 0x1c5   : > { %v392_v27 = vpop.f32.mrb[0].mxu1 }
 0x1c6   : > { %v393_v28 = vadd.f32 %v478_v26, %v392_v27  ;;  %v527_v29 = vpop.f32.mrb[1].mxu1 }
 0x1c8   : > { %396 = vst [vmem:[%s215_s9] sm:$0xff] %v393_v28 }
 0x1c9   : > { %601 = shalt.err (!%p598_p3)
}
 0x1ca   : > { %s602_s23 = scalar_lea.hbm %s786_s13, 128  ;;  %s606_s30 = scalar_lea.hbm %s833_s5, 256 }
 0x1cb   : > { %p603_p4 = scmp.ne.s32.totalorder %s786_s13, %s602_s23  ;;  %p607_p9 = scmp.lt.u32.totalorder %s786_s13, %s833_s5 }
 0x1cc   : > { %p608_p10 = scmp.lt.u32.totalorder %s606_s30, %s602_s23  ;;  %p610_p12 = scmp.lt.u32.totalorder %s602_s23, %s786_s13 }
 0x1cd   : > { %p604_p7 = pnand %p603_p4, %p724_p5 }
 0x1ce   : > { %p609_p11 = por %p608_p10, %p607_p9 }
 0x1cf   : > { %p605_p8 = pneg %p604_p7 }
 0x1d0   : > { %p611_p13 = por %p610_p12, %p609_p11 }
 0x1d2   : > { %p612_p0 = pnand %p611_p13, %p605_p8 }
 0x1d4   : > { %615 = shalt.err (!%p612_p0)
}
 0x1d5   : > { %546 = dma.vmem_to_hbm [thread:$0]  (%p724_p5), %s788_s10, 128, %s786_s13, %s398_s14  }
 0x1d6 PF: > { %p552_p1 = scmp.ge.s32.totalorder %s650_s21, 2  ;;  %s423_s8 = sand.u32 1, %s638_s18  }
 0x1d7   : > { %s424_s9 = scalar_lea.sflag [#allocation3], %s423_s8 }
 0x1d8   : > { %p549_p2 = pnand %p552_p1, %p728_p6 }
 0x1da   : > { %633 = dma.done.wait (!%p549_p2), %s424_s9, 128  }
 0x1db   : > { %635 = vsyncadd (!%p549_p2), %s424_s9, 4294967168  ;;  %p15_p3 = scmp.ge.s32.totalorder %s711_s24, 4   ;;  %s836_s18 = smov %s642_s19 }
 0x1dc   : > { %s837_s19 = smov %s646_s20  ;;  %s838_s20 = smov %s722_s27 }
 0x1dd   : > { %s839_s21 = smov %s711_s24  ;;  %17 = sbr.rel (!%p15_p3) target bundleno = 3 (0x3), region = 75 }
 0x1e4   :  { %429 = vsyncpa [#allocation3], 1 }
 0x1e5   :  { %431 = vsyncpa [#allocation3 + $0x1], 1 }

</bundles_post_ra>
